<compile_context>
chip_gen: v5e
topology: v5e:2x2
jax: 0.10.0
libtpu: 0.0.40
codegen_flags: <defaults>
</compile_context>

<pallas_src>
import jax
import jax.numpy as jnp
from jax.experimental import pallas as pl
from jax.experimental.pallas import tpu as pltpu

_VMEM = pltpu.MemorySpace.VMEM


def policy_forward_kernel(xt_ref, w1t_ref, b1_ref, w2_ref, b2_ref, out_ref):
    """Feature-major forward pass on one VMEM-resident batch tile.

    Batch sits in the 128-lane axis; feature axes sit in sublanes, so every
    load / compute / store is lane-dense.

    xt_ref : (n_obs,     Bt)        f32  -- x transposed
    w1t_ref: (hidden,    n_obs)     f32  -- layer1 weight, torch (out, in) layout
    b1_ref : (hidden,    1)         f32
    w2_ref : (hidden,    n_actions) f32  -- layer2 weight, (in, out) layout
    b2_ref : (n_actions, 1)         f32
    out_ref: (n_actions, Bt)        f32  -- softmax probabilities, transposed
    """
    n_obs, bt = xt_ref.shape
    hidden, n_actions = w2_ref.shape

    xt = xt_ref[...]
    w1t = w1t_ref[...]

    # ---- layer1: h^T = W1^T x^T + b1 ---------------------------------------
    # n_obs is tiny (4): short unrolled chain of broadcast-FMAs on the VPU;
    # no MXU push/pop latency for a <2%-utilized matmul.
    h = jnp.broadcast_to(b1_ref[...], (hidden, bt))
    for k in range(n_obs):
        h = h + w1t[:, k:k + 1] * xt[k:k + 1, :]

    # Dropout(p=0.6) in eval mode == identity, then ReLU.
    # TODO(synk): training-mode dropout needs pltpu.prng_seed / prng_random_bits.
    h = jnp.maximum(h, 0.0)

    # ---- layer2: logits^T = W2^T h^T + b2 ----------------------------------
    # n_actions is tiny (2): per-action elementwise multiply + sublane-sum.
    w2 = w2_ref[...]
    rows = [
        jnp.sum(w2[:, a:a + 1] * h, axis=0, keepdims=True)
        for a in range(n_actions)
    ]
    logits = jnp.concatenate(rows, axis=0) + b2_ref[...]        # (n_actions, Bt)

    # ---- softmax over actions (dim=1 of the original layout) ---------------
    # Reduction is over the tiny sublane axis -> cheap per-column VPU max/add.
    m = jnp.max(logits, axis=0, keepdims=True)
    e = jnp.exp(logits - m)
    denom = jnp.sum(e, axis=0, keepdims=True)
    out_ref[...] = e / denom          # exact normalization (matches torch softmax)


def _policy_forward_small(xt, w1t, b1c, w2, b2c):
    """Single-tile path: whole problem lives in VMEM, no grid / pipelining.

    At B=O(1) (action selection) the pallas_call dispatch dominates the few
    hundred FLOPs of math; embed this call in the caller's larger jit region
    so dispatch is amortized.
    """
    n_actions = w2.shape[1]
    B = xt.shape[1]
    return pl.pallas_call(
        policy_forward_kernel,
        out_shape=jax.ShapeDtypeStruct((n_actions, B), jnp.float32),
        in_specs=[pl.BlockSpec(memory_space=_VMEM)] * 5,
        out_specs=pl.BlockSpec(memory_space=_VMEM),
    )(xt, w1t, b1c, w2, b2c)


def _policy_forward_tiled(xt, w1t, b1c, w2, b2c, tile_b):
    """Batch-tiled path for huge rollout batches (B > tile_b).

    Ragged last tile handled by Pallas edge masking (no jnp.pad HBM copy):
    columns are independent, so edge garbage never reaches valid outputs.
    """
    n_obs, B = xt.shape
    hidden, n_actions = w2.shape
    return pl.pallas_call(
        policy_forward_kernel,
        out_shape=jax.ShapeDtypeStruct((n_actions, B), jnp.float32),
        grid=(pl.cdiv(B, tile_b),),
        in_specs=[
            pl.BlockSpec((n_obs, tile_b), lambda i: (0, i)),      # x^T: batch tiled along lanes
            pl.BlockSpec((hidden, n_obs), lambda i: (0, 0)),      # W1^T: VMEM-resident
            pl.BlockSpec((hidden, 1), lambda i: (0, 0)),          # b1
            pl.BlockSpec((hidden, n_actions), lambda i: (0, 0)),  # W2
            pl.BlockSpec((n_actions, 1), lambda i: (0, 0)),       # b2
        ],
        out_specs=pl.BlockSpec((n_actions, tile_b), lambda i: (0, i)),
        # Near-neutral on v5e/v6e; lets v7x shard independent batch tiles.
        compiler_params=pltpu.CompilerParams(
            dimension_semantics=("parallel",)),
    )(xt, w1t, b1c, w2, b2c)


def policy_forward(x, w1, b1, w2, b2, *, tile_b=8192):
    """Policy.forward(x) == softmax(relu(dropout_eval(x @ W1 + b1)) @ W2 + b2).

    x  : (B, n_obs) f32
    w1 : (n_obs, hidden),    b1: (hidden,)       -- layer1, stored (in, out)
    w2 : (hidden, n_actions), b2: (n_actions,)   -- layer2, stored (in, out)
    Returns (B, n_actions) probabilities; rows sum to 1.
    """
    assert tile_b % 128 == 0, "tile_b must be a lane multiple (128)"
    B, n_obs = x.shape
    hidden = w1.shape[1]
    n_actions = w2.shape[1]

    # Feature-major layout plumbing (cheap wrapper-side transposes of tiny
    # arrays) so the kernel is lane-dense in the batch dimension.
    xt = x.T                            # (n_obs, B)
    w1t = w1.T                          # (hidden, n_obs)
    b1c = b1.reshape(hidden, 1)
    b2c = b2.reshape(n_actions, 1)

    if B <= tile_b:
        out_t = _policy_forward_small(xt, w1t, b1c, w2, b2c)
    else:
        out_t = _policy_forward_tiled(xt, w1t, b1c, w2, b2c, tile_b)
    return out_t.T                      # (B, n_actions)


def init_linear_params(key, in_features, out_features):
    """PyTorch nn.Linear default init: U(-1/sqrt(in), 1/sqrt(in))."""
    k_w, k_b = jax.random.split(key)
    bound = 1.0 / jnp.sqrt(jnp.float32(in_features))
    # Stored as (in, out) so the math matches torch's x @ W.T.
    w = jax.random.uniform(k_w, (in_features, out_features), jnp.float32,
                           minval=-bound, maxval=bound)
    b = jax.random.uniform(k_b, (out_features,), jnp.float32,
                           minval=-bound, maxval=bound)
    return w, b


def _reference(x, w1, b1, w2, b2):
    """Pure-JAX reference (full-precision dots so f32 comparison is meaningful)."""
    hi = jax.lax.Precision.HIGHEST
    h = jnp.maximum(jnp.dot(x, w1, precision=hi) + b1, 0.0)
    logits = jnp.dot(h, w2, precision=hi) + b2
    return jax.nn.softmax(logits, axis=1)


if __name__ == "__main__":
    # Small shapes consistent with a CartPole-style policy net.
    batch = 2
    n_observations = 4
    hidden_size = 32
    n_actions = 2

    key = jax.random.PRNGKey(0)
    k_x, k_l1, k_l2, k_big = jax.random.split(key, 4)

    x = jax.random.normal(k_x, (batch, n_observations), jnp.float32)
    w1, b1 = init_linear_params(k_l1, n_observations, hidden_size)
    w2, b2 = init_linear_params(k_l2, hidden_size, n_actions)

    fwd = jax.jit(policy_forward, static_argnames=("tile_b",))

    # --- small-batch (single-tile, no-grid) path -----------------------------
    probs = jax.block_until_ready(fwd(x, w1, b1, w2, b2))
    ref = _reference(x, w1, b1, w2, b2)
    assert probs.shape == (batch, n_actions)
    assert jnp.allclose(probs, ref, atol=1e-3), (probs, ref)
    assert jnp.allclose(jnp.sum(probs, axis=1), 1.0, atol=1e-3)

    # --- batch-tiled path with a ragged last tile (1280 = 2.5 x 512) --------
    big_batch = 1280
    x_big = jax.random.normal(k_big, (big_batch, n_observations), jnp.float32)
    probs_big = jax.block_until_ready(fwd(x_big, w1, b1, w2, b2, tile_b=512))
    ref_big = _reference(x_big, w1, b1, w2, b2)
    assert probs_big.shape == (big_batch, n_actions)
    assert jnp.allclose(probs_big, ref_big, atol=1e-3), float(
        jnp.max(jnp.abs(probs_big - ref_big)))
    assert jnp.allclose(jnp.sum(probs_big, axis=1), 1.0, atol=1e-3)

    print("KERNEL_OK")
</pallas_src>

<mosaic_0001>
module attributes {stable_mosaic.version = 11 : i64} {
  func.func @policy_forward_kernel(%arg0: memref<4x2xf32, #tpu.memory_space<vmem>>, %arg1: memref<32x4xf32, #tpu.memory_space<vmem>>, %arg2: memref<32x1xf32, #tpu.memory_space<vmem>>, %arg3: memref<32x2xf32, #tpu.memory_space<vmem>>, %arg4: memref<2x1xf32, #tpu.memory_space<vmem>>, %arg5: memref<2x2xf32, #tpu.memory_space<vmem>>) attributes {dimension_semantics = [], scalar_prefetch = 0 : i64, scratch_operands = 0 : i64, tpu.core_type = #tpu.core_type<tc>} {
    %c0 = arith.constant 0 : index
    %c0_0 = arith.constant 0 : index
    %0 = vector.load %arg0[%c0, %c0_0] : memref<4x2xf32, #tpu.memory_space<vmem>>, vector<4x2xf32>
    %c0_1 = arith.constant 0 : index
    %c0_2 = arith.constant 0 : index
    %1 = vector.load %arg1[%c0_1, %c0_2] : memref<32x4xf32, #tpu.memory_space<vmem>>, vector<32x4xf32>
    %c0_3 = arith.constant 0 : index
    %c0_4 = arith.constant 0 : index
    %2 = vector.load %arg2[%c0_3, %c0_4] : memref<32x1xf32, #tpu.memory_space<vmem>>, vector<32x1xf32>
    %3 = vector.shape_cast %2 : vector<32x1xf32> to vector<32x1xf32>
    %4 = vector.broadcast %3 : vector<32x1xf32> to vector<32x2xf32>
    %5 = vector.extract_strided_slice %1 {offsets = [0, 0], sizes = [32, 1], strides = [1, 1]} : vector<32x4xf32> to vector<32x1xf32>
    %6 = vector.extract_strided_slice %0 {offsets = [0, 0], sizes = [1, 2], strides = [1, 1]} : vector<4x2xf32> to vector<1x2xf32>
    %7 = vector.broadcast %5 : vector<32x1xf32> to vector<32x2xf32>
    %8 = vector.broadcast %6 : vector<1x2xf32> to vector<32x2xf32>
    %9 = arith.mulf %7, %8 : vector<32x2xf32>
    %10 = arith.addf %4, %9 : vector<32x2xf32>
    %11 = vector.extract_strided_slice %1 {offsets = [0, 1], sizes = [32, 1], strides = [1, 1]} : vector<32x4xf32> to vector<32x1xf32>
    %12 = vector.extract_strided_slice %0 {offsets = [1, 0], sizes = [1, 2], strides = [1, 1]} : vector<4x2xf32> to vector<1x2xf32>
    %13 = vector.broadcast %11 : vector<32x1xf32> to vector<32x2xf32>
    %14 = vector.broadcast %12 : vector<1x2xf32> to vector<32x2xf32>
    %15 = arith.mulf %13, %14 : vector<32x2xf32>
    %16 = arith.addf %10, %15 : vector<32x2xf32>
    %17 = vector.extract_strided_slice %1 {offsets = [0, 2], sizes = [32, 1], strides = [1, 1]} : vector<32x4xf32> to vector<32x1xf32>
    %18 = vector.extract_strided_slice %0 {offsets = [2, 0], sizes = [1, 2], strides = [1, 1]} : vector<4x2xf32> to vector<1x2xf32>
    %19 = vector.broadcast %17 : vector<32x1xf32> to vector<32x2xf32>
    %20 = vector.broadcast %18 : vector<1x2xf32> to vector<32x2xf32>
    %21 = arith.mulf %19, %20 : vector<32x2xf32>
    %22 = arith.addf %16, %21 : vector<32x2xf32>
    %23 = vector.extract_strided_slice %1 {offsets = [0, 3], sizes = [32, 1], strides = [1, 1]} : vector<32x4xf32> to vector<32x1xf32>
    %24 = vector.extract_strided_slice %0 {offsets = [3, 0], sizes = [1, 2], strides = [1, 1]} : vector<4x2xf32> to vector<1x2xf32>
    %25 = vector.broadcast %23 : vector<32x1xf32> to vector<32x2xf32>
    %26 = vector.broadcast %24 : vector<1x2xf32> to vector<32x2xf32>
    %27 = arith.mulf %25, %26 : vector<32x2xf32>
    %28 = arith.addf %22, %27 : vector<32x2xf32>
    %cst = arith.constant 0.000000e+00 : f32
    %29 = vector.broadcast %cst : f32 to vector<32x2xf32>
    %30 = arith.maximumf %28, %29 : vector<32x2xf32>
    %c0_5 = arith.constant 0 : index
    %c0_6 = arith.constant 0 : index
    %31 = vector.load %arg3[%c0_5, %c0_6] : memref<32x2xf32, #tpu.memory_space<vmem>>, vector<32x2xf32>
    %32 = vector.extract_strided_slice %31 {offsets = [0, 0], sizes = [32, 1], strides = [1, 1]} : vector<32x2xf32> to vector<32x1xf32>
    %33 = vector.broadcast %32 : vector<32x1xf32> to vector<32x2xf32>
    %34 = arith.mulf %33, %30 : vector<32x2xf32>
    %cst_7 = arith.constant dense<0.000000e+00> : vector<2xf32>
    %35 = vector.multi_reduction <add>, %34, %cst_7 [0] : vector<32x2xf32> to vector<2xf32>
    %36 = vector.shape_cast %35 : vector<2xf32> to vector<1x2xf32>
    %37 = vector.extract_strided_slice %31 {offsets = [0, 1], sizes = [32, 1], strides = [1, 1]} : vector<32x2xf32> to vector<32x1xf32>
    %38 = vector.broadcast %37 : vector<32x1xf32> to vector<32x2xf32>
    %39 = arith.mulf %38, %30 : vector<32x2xf32>
    %cst_8 = arith.constant dense<0.000000e+00> : vector<2xf32>
    %40 = vector.multi_reduction <add>, %39, %cst_8 [0] : vector<32x2xf32> to vector<2xf32>
    %41 = vector.shape_cast %40 : vector<2xf32> to vector<1x2xf32>
    %42 = tpu.concatenate %36, %41 in 0 : vector<1x2xf32>, vector<1x2xf32> -> vector<2x2xf32>
    %c0_9 = arith.constant 0 : index
    %c0_10 = arith.constant 0 : index
    %43 = vector.load %arg4[%c0_9, %c0_10] : memref<2x1xf32, #tpu.memory_space<vmem>>, vector<2x1xf32>
    %44 = vector.broadcast %43 : vector<2x1xf32> to vector<2x2xf32>
    %45 = arith.addf %42, %44 : vector<2x2xf32>
    %cst_11 = arith.constant dense<0xFF800000> : vector<2xf32>
    %46 = vector.multi_reduction <maximumf>, %45, %cst_11 [0] : vector<2x2xf32> to vector<2xf32>
    %47 = vector.shape_cast %46 : vector<2xf32> to vector<1x2xf32>
    %48 = vector.broadcast %47 : vector<1x2xf32> to vector<2x2xf32>
    %49 = arith.subf %45, %48 : vector<2x2xf32>
    %50 = math.exp %49 : vector<2x2xf32>
    %cst_12 = arith.constant dense<0.000000e+00> : vector<2xf32>
    %51 = vector.multi_reduction <add>, %50, %cst_12 [0] : vector<2x2xf32> to vector<2xf32>
    %52 = vector.shape_cast %51 : vector<2xf32> to vector<1x2xf32>
    %53 = vector.broadcast %52 : vector<1x2xf32> to vector<2x2xf32>
    %54 = arith.divf %50, %53 : vector<2x2xf32>
    %c0_13 = arith.constant 0 : index
    %c0_14 = arith.constant 0 : index
    %55 = vector.load %arg5[%c0_13, %c0_14] : memref<2x2xf32, #tpu.memory_space<vmem>>, vector<2x2xf32>
    tpu.vector_store %arg5[%c0_13, %c0_14], %54 {strides = array<i32>} : memref<2x2xf32, #tpu.memory_space<vmem>>, vector<2x2xf32>,
    return
  }
}

</mosaic_0001>

<bundles_post_ra>
// kernel: policy_forward.1
= control target key start
LH: loop header
LB: loop body
LE: loop exit
PB: predicated region body
PF: predicated region fallthrough
CT: control target
= control target key end

     0   :  { %v307_v0 = vmov 0   ;;  %v308_v9 = vmov 1   ;;  %v309_v10 = vmov 2   ;;  %v310_v11 = vmov 3   ;;  %s397_s2 = inlined_call_operand.vmem [shape: f32[32,1], index: 2, kind: input, shape index: {}]   ;;  %s398_s1 = inlined_call_operand.vmem [shape: f32[32,4], index: 1, kind: input, shape index: {}]   ;;  %s399_s3 = inlined_call_operand.vmem [shape: f32[32,2], index: 3, kind: input, shape index: {}]   ;;  %s400_s4 = inlined_call_operand.vmem [shape: f32[2,1], index: 4, kind: input, shape index: {}]   ;;  %s401_s0 = inlined_call_operand.vmem [shape: f32[4,2], index: 0, kind: input, shape index: {}]   ;;  %s402_s5 = inlined_call_operand.vmem [shape: f32[2,2], index: 5, kind: output, shape index: {}]  }
   0x1   :  { %285 = vset.pattern.permute.xlu2 %v307_v0  ;;  %284 = vset.pattern.permute.xlu1 %v307_v0  ;;  %v27_v1 = vld [vmem:[%s397_s2 + $0x10] sm:$0xff]  ;;  %v25_v2 = vld [vmem:[%s397_s2] sm:$0xff]  ;;  %v28_v4 = vld [vmem:[%s397_s2 + $0x18] sm:$0xff]  ;;  %vm185_vm0 = vcmask 15360   ;;  %vm232_vm1 = vcmask 1040384   ;;  %vm241_vm2 = vcmask 9216  }
   0x2   :  { %v21_v3 = vld [vmem:[%s398_s1] sm:$0xff]  ;;  %283 = vset.pattern.permute.xlu0 %v307_v0  ;;  %41 = vperm.xlu1 %284, %v27_v1   ;;  %v26_v5 = vld [vmem:[%s397_s2 + $0x8] sm:$0xff]  ;;  %v24_v7 = vld [vmem:[%s398_s1 + $0x18] sm:$0xff] }
   0x3   :  { %31 = vperm.xlu0 %283, %v25_v2   ;;  %51 = vperm.xlu2 %285, %v21_v3   ;;  %v22_v6 = vld [vmem:[%s398_s1 + $0x8] sm:$0xff]  ;;  %v23_v8 = vld [vmem:[%s398_s1 + $0x10] sm:$0xff]  ;;  %v157_v13 = vld [vmem:[%s399_s3] sm:$0xff] }
   0x4   :  { %v159_v12 = vld [vmem:[%s399_s3 + $0x10] sm:$0xff]  ;;  %v158_v14 = vld [vmem:[%s399_s3 + $0x8] sm:$0xff]  ;;  %v160_v15 = vld [vmem:[%s399_s3 + $0x18] sm:$0xff] }
   0x5   :  { %v234_v16 = vld [vmem:[%s400_s4] sm:$0x3] }
   0x6   :  { %v20_v31 = vld [vmem:[%s401_s0] sm:$0xf] }
   0x7   :  { %v69_v32 = vperm.slane %v20_v31, 0  ;;  %v94_v35 = vperm.slane %v20_v31, 1  ;;  %v119_v41 = vperm.slane %v20_v31, 2  ;;  %v144_v45 = vperm.slane %v20_v31, 3 }
   0xa   :  { %46 = vperm.xlu1 %284, %v28_v4  }
   0xb   :  { %36 = vperm.xlu0 %283, %v26_v5   ;;  %56 = vperm.xlu2 %285, %v22_v6  }
  0x12   :  { %66 = vperm.xlu1 %284, %v24_v7  }
  0x13   :  { %61 = vperm.xlu0 %283, %v23_v8   ;;  %286 = vset.pattern.permute.xlu2 %v308_v9 }
  0x14   :  { %79 = vperm.xlu2 %286, %v21_v3  }
  0x1a   :  { %288 = vset.pattern.permute.xlu1 %v308_v9 }
  0x1b   :  { %287 = vset.pattern.permute.xlu0 %v308_v9  ;;  %87 = vperm.xlu1 %288, %v23_v8  }
  0x1c   :  { %83 = vperm.xlu0 %287, %v22_v6   ;;  %289 = vset.pattern.permute.xlu2 %v309_v10 }
  0x1d   :  { %104 = vperm.xlu2 %289, %v21_v3  }
  0x23   :  { %290 = vset.pattern.permute.xlu1 %v309_v10 }
  0x24   :  { %292 = vset.pattern.permute.xlu0 %v309_v10  ;;  %108 = vperm.xlu1 %290, %v22_v6  }
  0x25   :  { %112 = vperm.xlu0 %292, %v23_v8   ;;  %291 = vset.pattern.permute.xlu2 %v308_v9 }
  0x26   :  { %91 = vperm.xlu2 %291, %v24_v7  }
  0x2c   :  { %293 = vset.pattern.permute.xlu1 %v310_v11 }
  0x2d   :  { %296 = vset.pattern.permute.xlu0 %v310_v11  ;;  %129 = vperm.xlu1 %293, %v21_v3  }
  0x2e   :  { %141 = vperm.xlu0 %296, %v24_v7   ;;  %294 = vset.pattern.permute.xlu2 %v310_v11 }
  0x2f   :  { %133 = vperm.xlu2 %294, %v22_v6  }
  0x35   :  { %295 = vset.pattern.permute.xlu1 %v309_v10 }
  0x36   :  { %301 = vset.pattern.permute.xlu0 %v307_v0  ;;  %116 = vperm.xlu1 %295, %v24_v7  }
  0x37   :  { %173 = vperm.xlu0 %301, %v159_v12   ;;  %137 = vperm.xlu2 %294, %v23_v8  }
  0x3e   :  { %297 = vset.pattern.permute.xlu1 %v307_v0 }
  0x3f   :  { %298 = vset.pattern.permute.xlu2 %v307_v0  ;;  %163 = vperm.xlu1 %297, %v157_v13  }
  0x40   :  { %168 = vperm.xlu2 %298, %v158_v14  }
  0x47   :  { %299 = vset.pattern.permute.xlu1 %v308_v9 }
  0x48   :  { %300 = vset.pattern.permute.xlu2 %v308_v9  ;;  %200 = vperm.xlu1 %299, %v157_v13  }
  0x49   :  { %204 = vperm.xlu2 %300, %v158_v14  }
  0x50   :  { %208 = vperm.xlu1 %299, %v159_v12  }
  0x51   :  { %302 = vset.pattern.permute.xlu2 %v307_v0 }
  0x52   :  { %178 = vperm.xlu2 %302, %v160_v15  }
  0x58   :  { %212 = vperm.xlu1 %299, %v160_v15  }
  0x5a   :  { %237 = vperm.xlu2 %302, %v234_v16  }
  0x5d   :  { %v52_v17 = vpop.permute.xlu2 %51 }
  0x5e   :  { %v70_v34 = vmul.f32 %v69_v32, %v52_v17 }
  0x65   :  { %v57_v18 = vpop.permute.xlu2 %56 }
  0x66   :  { %v71_v38 = vmul.f32 %v69_v32, %v57_v18 }
  0x6e   :  { %v80_v20 = vpop.permute.xlu2 %79 }
  0x6f   :  { %v95_v39 = vmul.f32 %v94_v35, %v80_v20 }
  0x74   :  { %v42_v19 = vpop.permute.xlu1 %41 }
  0x75   :  { %v32_v21 = vpop.permute.xlu0 %31 }
  0x76   :  { %v74_v40 = vadd.f32 %v70_v34, %v32_v21 }
  0x77   :  { %v105_v23 = vpop.permute.xlu2 %104 }
  0x78   :  { %v99_v47 = vadd.f32 %v95_v39, %v74_v40  ;;  %v120_v48 = vmul.f32 %v119_v41, %v105_v23 }
  0x7a   :  { %v124_v58 = vadd.f32 %v120_v48, %v99_v47 }
  0x7c   :  { %v47_v22 = vpop.permute.xlu1 %46 }
  0x7d   :  { %v37_v25 = vpop.permute.xlu0 %36 }
  0x7e   :  { %v75_v44 = vadd.f32 %v71_v38, %v37_v25 }
  0x80   :  { %v92_v26 = vpop.permute.xlu2 %91 }
  0x81   :  { %v98_v59 = vmul.f32 %v94_v35, %v92_v26 }
  0x84   :  { %v67_v24 = vpop.permute.xlu1 %66 }
  0x85   :  { %v62_v28 = vpop.permute.xlu0 %61  ;;  %v73_v49 = vmul.f32 %v69_v32, %v67_v24 }
  0x86   :  { %v72_v50 = vmul.f32 %v69_v32, %v62_v28 }
  0x87   :  { %v77_v60 = vadd.f32 %v73_v49, %v47_v22 }
  0x88   :  { %v76_v61 = vadd.f32 %v72_v50, %v42_v19 }
  0x89   :  { %v134_v29 = vpop.permute.xlu2 %133  ;;  %v102_v6 = vadd.f32 %v98_v59, %v77_v60 }
  0x8a   :  { %v146_v54 = vmul.f32 %v144_v45, %v134_v29 }
  0x8d   :  { %v88_v27 = vpop.permute.xlu1 %87 }
  0x8e   :  { %v84_v33 = vpop.permute.xlu0 %83  ;;  %v97_v55 = vmul.f32 %v94_v35, %v88_v27 }
  0x8f   :  { %v96_v42 = vmul.f32 %v94_v35, %v84_v33 }
  0x90   :  { %v101_v0 = vadd.f32 %v97_v55, %v76_v61 }
  0x91   :  { %v138_v36 = vpop.permute.xlu2 %137  ;;  %v100_v51 = vadd.f32 %v96_v42, %v75_v44 }
  0x92   :  { %v147_v4 = vmul.f32 %v144_v45, %v138_v36 }
  0x96   :  { %v109_v30 = vpop.permute.xlu1 %108 }
  0x97   :  { %v113_v43 = vpop.permute.xlu0 %112  ;;  %v121_v46 = vmul.f32 %v119_v41, %v109_v30 }
  0x98   :  { %v122_v62 = vmul.f32 %v119_v41, %v113_v43 }
  0x99   :  { %v125_v56 = vadd.f32 %v121_v46, %v100_v51 }
  0x9a   :  { %v169_v52 = vpop.permute.xlu2 %168  ;;  %v126_v5 = vadd.f32 %v122_v62, %v101_v0 }
  0x9b   :  { %v150_v1 = vadd.f32 %v146_v54, %v125_v56 }
  0x9c   :  { %v151_v13 = vadd.f32 %v147_v4, %v126_v5 }
  0x9d   :  { %v154_v7 = vmax.f32 %v150_v1, 0.0 }
  0x9e   :  { %v155_v18 = vmax.f32 %v151_v13, 0.0 }
  0x9f   :  { %v130_v37 = vpop.permute.xlu1 %129  ;;  %v182_v15 = vmul.f32 %v169_v52, %v154_v7 }
  0xa0   :  { %v145_v57 = vmul.f32 %v144_v45, %v130_v37  ;;  %v142_v63 = vpop.permute.xlu0 %141 }
  0xa1   :  { %v148_v8 = vmul.f32 %v144_v45, %v142_v63  ;;  %v187_v20 = vsel %vm185_vm0, %v182_v15, 0.0 }
  0xa2   :  { %v149_v2 = vadd.f32 %v145_v57, %v124_v58 }
  0xa3   :  { %v205_v12 = vpop.permute.xlu2 %204 }
  0xa4   :  { %v153_v11 = vmax.f32 %v149_v2, 0.0  ;;  %v216_v33 = vmul.f32 %v205_v12, %v154_v7 }
  0xa6   :  { %v220_v37 = vsel %vm185_vm0, %v216_v33, 0.0 }
  0xa8   :  { %v117_v53 = vpop.permute.xlu1 %116 }
  0xa9   :  { %v123_v3 = vmul.f32 %v119_v41, %v117_v53  ;;  %v174_v17 = vpop.permute.xlu0 %173 }
  0xaa   :  { %v183_v21 = vmul.f32 %v174_v17, %v155_v18 }
  0xab   :  { %v127_v9 = vadd.f32 %v123_v3, %v102_v6 }
  0xac   :  { %v179_v23 = vpop.permute.xlu2 %178  ;;  %v189_v26 = vsel %vm185_vm0, %v183_v21, 0.0 }
  0xad   :  { %v152_v16 = vadd.f32 %v148_v8, %v127_v9 }
  0xaf   :  { %v156_v22 = vmax.f32 %v152_v16, 0.0 }
  0xb1   :  { %v164_v10 = vpop.permute.xlu1 %163  ;;  %v184_v27 = vmul.f32 %v179_v23, %v156_v22 }
  0xb2   :  { %v181_v14 = vmul.f32 %v164_v10, %v153_v11 }
  0xb3   :  { %v191_v29 = vsel %vm185_vm0, %v184_v27, 0.0 }
  0xb4   :  { %v186_v19 = vsel %vm185_vm0, %v181_v14, 0.0  ;;  %v238_v56 = vpop.permute.xlu2 %237 }
  0xb5   :  { %v188_v24 = vadd.f32 %v187_v20, %v186_v19 }
  0xb7   :  { %v190_v28 = vadd.f32 %v189_v26, %v188_v24 }
  0xb9   :  { %v192_v30 = vadd.f32 %v191_v29, %v190_v28 }
  0xba   :  { %v201_v25 = vpop.permute.xlu1 %200 }
  0xbb   :  { %v215_v32 = vmul.f32 %v201_v25, %v153_v11  ;;  %v193_v35 = vrot.slane %v192_v30, 4 }
  0xbd   :  { %v219_v36 = vsel %vm185_vm0, %v215_v32, 0.0  ;;  %v194_v39 = vadd.f32 %v193_v35, %v192_v30 }
  0xbe   :  { %v221_v40 = vadd.f32 %v220_v37, %v219_v36 }
  0xbf   :  { %v195_v46 = vrot.slane %v194_v39, 2 }
  0xc1   :  { %v196_v49 = vadd.f32 %v195_v46, %v194_v39 }
  0xc2   :  { %v209_v31 = vpop.permute.xlu1 %208 }
  0xc3   :  { %v217_v34 = vmul.f32 %v209_v31, %v155_v18  ;;  %v197_v52 = vrot.slane %v196_v49, 1 }
  0xc5   :  { %v222_v38 = vsel %vm185_vm0, %v217_v34, 0.0  ;;  %v198_v54 = vadd.f32 %v197_v52, %v196_v49 }
  0xc6   :  { %v223_v43 = vadd.f32 %v222_v38, %v221_v40 }
  0xca   :  { %v213_v41 = vpop.permute.xlu1 %212 }
  0xcb   :  { %v218_v42 = vmul.f32 %v213_v41, %v156_v22 }
  0xcd   :  { %v224_v44 = vsel %vm185_vm0, %v218_v42, 0.0 }
  0xce   :  { %v225_v45 = vadd.f32 %v224_v44, %v223_v43 }
  0xd0   :  { %v226_v47 = vrot.slane %v225_v45, 4 }
  0xd2   :  { %v227_v48 = vadd.f32 %v226_v47, %v225_v45 }
  0xd4   :  { %v228_v50 = vrot.slane %v227_v48, 2 }
  0xd6   :  { %v229_v51 = vadd.f32 %v228_v50, %v227_v48 }
  0xd8   :  { %v230_v53 = vrot.slane %v229_v51, 1 }
  0xda   :  { %v231_v55 = vadd.f32 %v230_v53, %v229_v51 }
  0xdc   :  { %v233_v57 = vsel %vm232_vm1, %v198_v54, %v231_v55 }
  0xdd   :  { %v240_v58 = vadd.f32 %v238_v56, %v233_v57 }
  0xdf   :  { %v242_v59 = vsel %vm241_vm2, %v240_v58, -inf }
  0xe0   :  { %v243_v60 = vrot.slane %v242_v59, 4 }
  0xe2   :  { %v244_v61 = vmax.f32 %v242_v59, %v243_v60 }
  0xe4   :  { %v245_v62 = vrot.slane %v244_v61, 2 }
  0xe6   :  { %v246_v63 = vmax.f32 %v244_v61, %v245_v62 }
  0xe8   :  { %v247_v0 = vrot.slane %v246_v63, 1 }
  0xea   :  { %v248_v1 = vmax.f32 %v246_v63, %v247_v0 }
  0xec   :  { %v249_v2 = vsub.f32 %v240_v58, %v248_v1 }
  0xee   :  { %v250_v3 = vmul.f32 1.442695, %v249_v2 }
  0xf0   :  { %303 = vpow2.f32 %v250_v3 }
  0xf6   :  { %v304_v4 = vpop.eup %303 }
  0xf7   :  { %v252_v5 = vsel %vm241_vm2, %v304_v4, 0.0 }
  0xf8   :  { %v253_v6 = vrot.slane %v252_v5, 4 }
  0xfa   :  { %v254_v7 = vadd.f32 %v253_v6, %v252_v5 }
  0xfc   :  { %v255_v8 = vrot.slane %v254_v7, 2 }
  0xfe   :  { %v256_v9 = vadd.f32 %v255_v8, %v254_v7 }
 0x100   :  { %v257_v10 = vrot.slane %v256_v9, 1 }
 0x102   :  { %v258_v11 = vadd.f32 %v257_v10, %v256_v9 }
 0x104   :  { %305 = vrcp.f32 %v258_v11  ;;  %v270_v15 = vand.u32 2147483648, %v258_v11  ;;  %v268_v17 = vand.u32 2147483647, %v258_v11  ;;  %vm264_vm4 = vweird.f32 %v258_v11 }
 0x106   :  { %v271_v19 = vor.u32 1.1754944e-38, %v270_v15  ;;  %vm269_vm6 = vcmp.eq.f32.partialorder %v268_v17, 8.507059e+37 }
 0x10a   :  { %v306_v12 = vpop.eup %305 }
 0x10b   :  { %v260_v13 = vmul.f32 %v306_v12, %v258_v11  ;;  %vm265_vm3 = vweird.f32 %v306_v12 }
 0x10c   :  { %vm266_vm5 = vmor %vm264_vm4, %vm265_vm3 }
 0x10d   :  { %v261_v14 = vsub.f32 1.0, %v260_v13 }
 0x10f   :  { %v262_v16 = vmul.f32 %v306_v12, %v261_v14 }
 0x111   :  { %v263_v18 = vadd.f32 %v306_v12, %v262_v16 }
 0x113   :  { %v267_v20 = vsel %vm266_vm5, %v306_v12, %v263_v18 }
 0x114   :  { %v272_v21 = vsel %vm269_vm6, %v271_v19, %v267_v20 }
 0x115   :  { %v273_v22 = vmul.f32 %v304_v4, %v272_v21 }
 0x117   :  { %274 = vst.msk [vmem:[%s402_s5] sm:$0x3] %vm241_vm2, %v273_v22 }

</bundles_post_ra>
